<compile_context>
chip_gen: v5e
topology: v5e:2x2
jax: 0.10.0
libtpu: 0.0.40
codegen_flags: <defaults>
</compile_context>

<pallas_src>
import functools

import jax
import jax.numpy as jnp
from jax import lax
from jax.experimental import pallas as pl
from jax.experimental.pallas import tpu as pltpu

LANE = 128
PACK = 8          # tokens packed along the 128-lane axis (8 * H=16 = 128)


def _gelu_exact(x):
    # torch.nn.GELU() default = exact erf formulation.
    return 0.5 * x * (1.0 + lax.erf(x * jnp.float32(0.7071067811865476)))


def _round_up(x, m):
    return (x + m - 1) // m * m


def mix_model_kernel(x_ref, w_ref, b_ref, wc_ref, bc_ref, out_ref, *, n_block):
    """Fused forward for one packed-row tile.

    x_ref  : (tm, 128)                 8 tokens packed per row (lane groups of H=16)
    w_ref  : (n_block, 128, 128)       block-diagonal premixed fc weight (in, out)
    b_ref  : (n_block, 1, 128)         premixed fc bias, tiled 8x
    wc_ref : (128, 16)                 block-diagonal premixed cls weight (in, out)
    bc_ref : (1, 16)                   premixed cls bias, tiled 8x
    out_ref: (tm, 16)                  8 tokens x 2 logits per row (dense, narrow)
    """
    h0 = x_ref[...]

    def body(i, h):
        # fc_act_drop: x + Dropout(GELU(Linear(x))); Dropout = identity (eval).
        y = jnp.dot(h, w_ref[i], preferred_element_type=jnp.float32) + b_ref[i]
        return h + _gelu_exact(y)

    # Small fixed n_block (=2): full unroll keeps the LLO scheduler's view.
    h = lax.fori_loop(0, n_block, body, h0, unroll=True)

    out_ref[...] = (
        jnp.dot(h, wc_ref[...], preferred_element_type=jnp.float32) + bc_ref[...]
    )


def _premix(fc_w, fc_b, fc_logits, cls_w, cls_b, cls_logits):
    """Softmax-mix the per-model Linear weights (exact by linearity)."""
    fc_s = jax.nn.softmax(fc_logits, axis=-1)                  # (n_block, M)
    w_mixed = jnp.einsum("km,kmoh->kho", fc_s, fc_w)           # (n_block, H_in, H_out)
    b_mixed = jnp.einsum("km,kmo->ko", fc_s, fc_b)             # (n_block, H)
    cls_s = jax.nn.softmax(cls_logits)                         # (M,)
    wc_mixed = jnp.einsum("m,moh->ho", cls_s, cls_w)           # (H, C)
    bc_mixed = jnp.einsum("m,mo->o", cls_s, cls_b)             # (C,)
    return w_mixed, b_mixed, wc_mixed, bc_mixed


@functools.partial(jax.jit,
                   static_argnames=("block_rows", "min_tokens_for_pallas"))
def mix_model_forward(x, fc_w, fc_b, fc_logits, cls_w, cls_b, cls_logits,
                      *, block_rows=32768, min_tokens_for_pallas=0):
    """Forward of MixModel_modify_graph.

    x          : (B, S, H) f32
    fc_w       : (n_block, M, H, H)  torch Linear layout (out, in), per model
    fc_b       : (n_block, M, H)
    fc_logits  : (n_block, M)        MixLayer.model_weight for each block fc
    cls_w      : (M, C, H)           C = 2
    cls_b      : (M, C)
    cls_logits : (M,)                MixLayer.model_weight for the cls head
    returns    : (B, S, C) f32
    """
    B, S, H = x.shape
    n_block, _ = fc_logits.shape
    C = cls_w.shape[1]
    N = B * S

    w_mixed, b_mixed, wc_mixed, bc_mixed = _premix(
        fc_w, fc_b, fc_logits, cls_w, cls_b, cls_logits)

    xf = x.reshape(N, H).astype(jnp.float32)

    # Plain-XLA path for tiny batches (launch/pipeline cost would dominate).
    if N < min_tokens_for_pallas:
        h = xf
        for k in range(n_block):
            h = h + _gelu_exact(h @ w_mixed[k] + b_mixed[k])
        return (h @ wc_mixed + bc_mixed).reshape(B, S, C)

    # ---- lane-pack PACK tokens into the 128-lane axis ----------------------
    assert LANE % H == 0 and LANE // H == PACK, "kernel assumes H=16"
    Np = pl.cdiv(N, PACK)                     # packed rows
    n_tok_pad = Np * PACK
    if n_tok_pad != N:
        xf = jnp.pad(xf, ((0, n_tok_pad - N), (0, 0)))
    xp = xf.reshape(Np, PACK * H)             # contiguous -> free reshape

    # Block-diagonal packed weights (built once per call, O(H^2) work).
    eye = jnp.eye(PACK, dtype=jnp.float32)
    w_blk = jnp.einsum("pq,kio->kpiqo", eye, w_mixed).reshape(
        n_block, PACK * H, PACK * H)                             # (n_block,128,128)
    b_blk = jnp.tile(b_mixed[:, None, :], (1, 1, PACK))          # (n_block,1,128)
    wc_blk = jnp.einsum("pq,io->piqo", eye, wc_mixed).reshape(
        PACK * H, PACK * C)                                      # (128,16)
    bc_blk = jnp.tile(bc_mixed[None, :], (1, PACK))              # (1,16)

    # ---- row tiling over packed rows ---------------------------------------
    tm_cap = max(8, block_rows // PACK)       # packed rows per grid step
    if Np <= 8:
        tm = 8
    else:
        # Keep the grid >= 2 steps when possible (v7x megacore sharding).
        tm = min(tm_cap, _round_up((Np + 1) // 2, 8))
    np_pad = _round_up(Np, tm)
    if np_pad != Np:
        xp = jnp.pad(xp, ((0, np_pad - Np), (0, 0)))

    grid = (np_pad // tm,)
    CW = PACK * C                             # packed classifier width = 16

    out = pl.pallas_call(
        functools.partial(mix_model_kernel, n_block=n_block),
        out_shape=jax.ShapeDtypeStruct((np_pad, CW), jnp.float32),
        grid_spec=pltpu.PrefetchScalarGridSpec(
            num_scalar_prefetch=0,
            grid=grid,
            in_specs=[
                # packed activations: tiled over rows
                pl.BlockSpec((tm, PACK * H), lambda i: (i, 0)),
                # weights/biases: resident (constant block index)
                pl.BlockSpec((n_block, PACK * H, PACK * H), lambda i: (0, 0, 0)),
                pl.BlockSpec((n_block, 1, PACK * H), lambda i: (0, 0, 0)),
                pl.BlockSpec((PACK * H, CW), lambda i: (0, 0)),
                pl.BlockSpec((1, CW), lambda i: (0, 0)),
            ],
            out_specs=pl.BlockSpec((tm, CW), lambda i: (i, 0)),
        ),
        compiler_params=pltpu.CompilerParams(
            # Row tiles are independent -> megacore sharding on v7x.
            dimension_semantics=("parallel",),
        ),
    )(xp, w_blk, b_blk, wc_blk, bc_blk)

    # Unpack: row r, lanes [q*C:(q+1)*C] are the logits of token r*PACK + q,
    # so a row-major reshape recovers token order (free).
    out_tok = out.reshape(np_pad * PACK, C)[:N]
    return out_tok.reshape(B, S, C)


# ---------------------------------------------------------------------------
# Parameter construction mirroring the torch module's shapes/conventions.
# ---------------------------------------------------------------------------
def init_params(key, n_block, input_size, n_models):
    H = input_size
    k_fc_w, k_fc_b, k_fc_l, k_c_w, k_c_b, k_c_l = jax.random.split(key, 6)
    bound = 1.0 / jnp.sqrt(H)

    # torch nn.Linear stores weight as (out, in).
    fc_w = jax.random.uniform(k_fc_w, (n_block, n_models, H, H),
                              jnp.float32, -bound, bound)
    fc_b = jax.random.uniform(k_fc_b, (n_block, n_models, H),
                              jnp.float32, -bound, bound)
    fc_logits = jax.random.normal(k_fc_l, (n_block, n_models), jnp.float32)

    cls_w = jax.random.uniform(k_c_w, (n_models, 2, H), jnp.float32, -bound, bound)
    cls_b = jax.random.uniform(k_c_b, (n_models, 2), jnp.float32, -bound, bound)
    cls_logits = jax.random.normal(k_c_l, (n_models,), jnp.float32)

    return fc_w, fc_b, fc_logits, cls_w, cls_b, cls_logits


def reference_forward(x, fc_w, fc_b, fc_logits, cls_w, cls_b, cls_logits):
    """Pure-JAX reference that follows the torch forward literally
    (per-model Linear outputs, softmax-weighted sum, exact GELU, residual)."""
    B, S, H = x.shape
    n_block, M = fc_logits.shape
    h = x.reshape(B * S, H)
    for k in range(n_block):
        s = jax.nn.softmax(fc_logits[k])
        outs = jnp.stack([h @ fc_w[k, m].T + fc_b[k, m] for m in range(M)], 0)
        y = (outs * s[:, None, None]).sum(0)
        y = 0.5 * y * (1.0 + lax.erf(y / jnp.sqrt(2.0)))
        h = h + y                     # dropout = identity (eval)
    s = jax.nn.softmax(cls_logits)
    outs = jnp.stack([h @ cls_w[m].T + cls_b[m] for m in range(M)], 0)
    out = (outs * s[:, None, None]).sum(0)
    return out.reshape(B, S, 2)


if __name__ == "__main__":
    # Spec: MixModel_modify_graph builds MyModel(n_block=2, input_size=16)
    # and mixes over len(model_list) source models (here 2).
    n_block, hidden, n_models = 2, 16, 2

    key = jax.random.PRNGKey(0)
    k_x, k_x2, k_p = jax.random.split(key, 3)
    params = init_params(k_p, n_block, hidden, n_models)

    # Small shape from the module spec (batch=2, seq=8, hidden=16).
    x = jax.random.normal(k_x, (2, 8, hidden), jnp.float32)
    out = mix_model_forward(x, *params)          # Pallas path (default)
    jax.block_until_ready(out)
    assert out.shape == (2, 8, 2), out.shape
    assert out.dtype == jnp.float32
    ref = reference_forward(x, *params)
    assert jnp.allclose(out, ref, atol=1e-4, rtol=1e-4), (
        float(jnp.max(jnp.abs(out - ref))))

    # Larger, non-multiple-of-8 shape: exercises lane-packing padding and a
    # multi-step ("parallel") grid.
    x2 = jax.random.normal(k_x2, (4, 300, hidden), jnp.float32)
    out2 = mix_model_forward(x2, *params)
    jax.block_until_ready(out2)
    ref2 = reference_forward(x2, *params)
    assert jnp.allclose(out2, ref2, atol=1e-4, rtol=1e-4), (
        float(jnp.max(jnp.abs(out2 - ref2))))

    print("KERNEL_OK")
</pallas_src>

<mosaic_0001>
module attributes {stable_mosaic.version = 11 : i64} {
  func.func @mix_model_kernel(%arg0: i32, %arg1: memref<8x128xf32, #tpu.memory_space<vmem>>, %arg2: memref<2x128x128xf32, #tpu.memory_space<vmem>>, %arg3: memref<2x1x128xf32, #tpu.memory_space<vmem>>, %arg4: memref<128x16xf32, #tpu.memory_space<vmem>>, %arg5: memref<1x16xf32, #tpu.memory_space<vmem>>, %arg6: memref<8x16xf32, #tpu.memory_space<vmem>>) attributes {dimension_semantics = [#tpu.dimension_semantics<parallel>], iteration_bounds = array<i64: 1>, scalar_prefetch = 0 : i64, scratch_operands = 0 : i64, tpu.core_type = #tpu.core_type<tc>, window_params = [{transform_indices = @transform_0, window_bounds = array<i64: 8, 128>}, {pipeline_mode = #tpu.pipeline_mode<synchronous>, transform_indices = @transform_1, window_bounds = array<i64: 2, 128, 128>}, {pipeline_mode = #tpu.pipeline_mode<synchronous>, transform_indices = @transform_2, window_bounds = array<i64: 2, 1, 128>}, {pipeline_mode = #tpu.pipeline_mode<synchronous>, transform_indices = @transform_3, window_bounds = array<i64: 128, 16>}, {pipeline_mode = #tpu.pipeline_mode<synchronous>, transform_indices = @transform_4, window_bounds = array<i64: 1, 16>}, {transform_indices = @transform_5, window_bounds = array<i64: 8, 16>}]} {
    %c0 = arith.constant 0 : index
    %c0_0 = arith.constant 0 : index
    %0 = vector.load %arg1[%c0, %c0_0] : memref<8x128xf32, #tpu.memory_space<vmem>>, vector<8x128xf32>
    %c0_i32 = arith.constant 0 : i32
    %1 = arith.index_cast %c0_i32 : i32 to index
    %c0_1 = arith.constant 0 : index
    %c0_2 = arith.constant 0 : index
    %2 = vector.load %arg2[%1, %c0_1, %c0_2] : memref<2x128x128xf32, #tpu.memory_space<vmem>>, vector<1x128x128xf32>
    %3 = vector.shape_cast %2 : vector<1x128x128xf32> to vector<128x128xf32>
    %cst = arith.constant dense<0.000000e+00> : vector<8x128xf32>
    %4 = tpu.matmul %0, %3, %cst {dimension_numbers = #tpu.dot_dimension_numbers<[1], [0], [0], [1], [0, 0, 1, 1], [], []>} : vector<8x128xf32>, vector<128x128xf32>, vector<8x128xf32> -> vector<8x128xf32>
    %5 = arith.index_cast %c0_i32 : i32 to index
    %c0_3 = arith.constant 0 : index
    %c0_4 = arith.constant 0 : index
    %6 = vector.load %arg3[%5, %c0_3, %c0_4] : memref<2x1x128xf32, #tpu.memory_space<vmem>>, vector<1x1x128xf32>
    %7 = vector.shape_cast %6 : vector<1x1x128xf32> to vector<1x128xf32>
    %8 = vector.broadcast %7 : vector<1x128xf32> to vector<8x128xf32>
    %9 = arith.addf %4, %8 : vector<8x128xf32>
    %cst_5 = arith.constant 5.000000e-01 : f32
    %10 = vector.broadcast %cst_5 : f32 to vector<8x128xf32>
    %11 = arith.mulf %10, %9 : vector<8x128xf32>
    %cst_6 = arith.constant 0.707106769 : f32
    %12 = vector.broadcast %cst_6 : f32 to vector<8x128xf32>
    %13 = arith.mulf %9, %12 : vector<8x128xf32>
    %14 = math.erf %13 : vector<8x128xf32>
    %cst_7 = arith.constant 1.000000e+00 : f32
    %15 = vector.broadcast %cst_7 : f32 to vector<8x128xf32>
    %16 = arith.addf %15, %14 : vector<8x128xf32>
    %17 = arith.mulf %11, %16 : vector<8x128xf32>
    %18 = arith.addf %0, %17 : vector<8x128xf32>
    %c1_i32 = arith.constant 1 : i32
    %19 = arith.index_cast %c1_i32 : i32 to index
    %c0_8 = arith.constant 0 : index
    %c0_9 = arith.constant 0 : index
    %20 = vector.load %arg2[%19, %c0_8, %c0_9] : memref<2x128x128xf32, #tpu.memory_space<vmem>>, vector<1x128x128xf32>
    %21 = vector.shape_cast %20 : vector<1x128x128xf32> to vector<128x128xf32>
    %cst_10 = arith.constant dense<0.000000e+00> : vector<8x128xf32>
    %22 = tpu.matmul %18, %21, %cst_10 {dimension_numbers = #tpu.dot_dimension_numbers<[1], [0], [0], [1], [0, 0, 1, 1], [], []>} : vector<8x128xf32>, vector<128x128xf32>, vector<8x128xf32> -> vector<8x128xf32>
    %23 = arith.index_cast %c1_i32 : i32 to index
    %c0_11 = arith.constant 0 : index
    %c0_12 = arith.constant 0 : index
    %24 = vector.load %arg3[%23, %c0_11, %c0_12] : memref<2x1x128xf32, #tpu.memory_space<vmem>>, vector<1x1x128xf32>
    %25 = vector.shape_cast %24 : vector<1x1x128xf32> to vector<1x128xf32>
    %26 = vector.broadcast %25 : vector<1x128xf32> to vector<8x128xf32>
    %27 = arith.addf %22, %26 : vector<8x128xf32>
    %cst_13 = arith.constant 5.000000e-01 : f32
    %28 = vector.broadcast %cst_13 : f32 to vector<8x128xf32>
    %29 = arith.mulf %28, %27 : vector<8x128xf32>
    %cst_14 = arith.constant 0.707106769 : f32
    %30 = vector.broadcast %cst_14 : f32 to vector<8x128xf32>
    %31 = arith.mulf %27, %30 : vector<8x128xf32>
    %32 = math.erf %31 : vector<8x128xf32>
    %cst_15 = arith.constant 1.000000e+00 : f32
    %33 = vector.broadcast %cst_15 : f32 to vector<8x128xf32>
    %34 = arith.addf %33, %32 : vector<8x128xf32>
    %35 = arith.mulf %29, %34 : vector<8x128xf32>
    %36 = arith.addf %18, %35 : vector<8x128xf32>
    %c2_i32 = arith.constant 2 : i32
    %c0_16 = arith.constant 0 : index
    %c0_17 = arith.constant 0 : index
    %37 = vector.load %arg4[%c0_16, %c0_17] : memref<128x16xf32, #tpu.memory_space<vmem>>, vector<128x16xf32>
    %cst_18 = arith.constant dense<0.000000e+00> : vector<8x16xf32>
    %38 = tpu.matmul %36, %37, %cst_18 {dimension_numbers = #tpu.dot_dimension_numbers<[1], [0], [0], [1], [0, 0, 1, 1], [], []>} : vector<8x128xf32>, vector<128x16xf32>, vector<8x16xf32> -> vector<8x16xf32>
    %c0_19 = arith.constant 0 : index
    %c0_20 = arith.constant 0 : index
    %39 = vector.load %arg5[%c0_19, %c0_20] : memref<1x16xf32, #tpu.memory_space<vmem>>, vector<1x16xf32>
    %40 = vector.broadcast %39 : vector<1x16xf32> to vector<8x16xf32>
    %41 = arith.addf %38, %40 : vector<8x16xf32>
    %c0_21 = arith.constant 0 : index
    %c0_22 = arith.constant 0 : index
    %42 = vector.load %arg6[%c0_21, %c0_22] : memref<8x16xf32, #tpu.memory_space<vmem>>, vector<8x16xf32>
    tpu.vector_store %arg6[%c0_21, %c0_22], %41 {strides = array<i32>} : memref<8x16xf32, #tpu.memory_space<vmem>>, vector<8x16xf32>,
    return
  }
  func.func @transform_0(%arg0: i32) -> (i32, i32) {
    %c0_i32 = arith.constant 0 : i32
    %c0_i32_0 = arith.constant 0 : i32
    return %arg0, %c0_i32 : i32, i32
  }
  func.func @transform_1(%arg0: i32) -> (i32, i32, i32) {
    %c0_i32 = arith.constant 0 : i32
    %c0_i32_0 = arith.constant 0 : i32
    %c0_i32_1 = arith.constant 0 : i32
    %c0_i32_2 = arith.constant 0 : i32
    return %c0_i32, %c0_i32_0, %c0_i32_1 : i32, i32, i32
  }
  func.func @transform_2(%arg0: i32) -> (i32, i32, i32) {
    %c0_i32 = arith.constant 0 : i32
    %c0_i32_0 = arith.constant 0 : i32
    %c0_i32_1 = arith.constant 0 : i32
    %c0_i32_2 = arith.constant 0 : i32
    return %c0_i32, %c0_i32_0, %c0_i32_1 : i32, i32, i32
  }
  func.func @transform_3(%arg0: i32) -> (i32, i32) {
    %c0_i32 = arith.constant 0 : i32
    %c0_i32_0 = arith.constant 0 : i32
    %c0_i32_1 = arith.constant 0 : i32
    return %c0_i32, %c0_i32_0 : i32, i32
  }
  func.func @transform_4(%arg0: i32) -> (i32, i32) {
    %c0_i32 = arith.constant 0 : i32
    %c0_i32_0 = arith.constant 0 : i32
    %c0_i32_1 = arith.constant 0 : i32
    return %c0_i32, %c0_i32_0 : i32, i32
  }
  func.func @transform_5(%arg0: i32) -> (i32, i32) {
    %c0_i32 = arith.constant 0 : i32
    %c0_i32_0 = arith.constant 0 : i32
    return %arg0, %c0_i32 : i32, i32
  }
}

</mosaic_0001>

<bundles_post_ra>
// kernel: mix_model_forward.1
= control target key start
LH: loop header
LB: loop body
LE: loop exit
PB: predicated region body
PF: predicated region fallthrough
CT: control target
= control target key end

     0   :  { %vm233_vm8 = vcmask 130048   ;;  %s470_s1 = inlined_call_operand.vmem [shape: f32[2,128,128], index: 1, kind: input, shape index: {}]   ;;  %s471_s2 = inlined_call_operand.vmem [shape: f32[2,1,128], index: 2, kind: input, shape index: {}]   ;;  %s472_s0 = inlined_call_operand.vmem [shape: f32[8,128], index: 0, kind: input, shape index: {}]   ;;  %s473_s4 = inlined_call_operand.vmem [shape: f32[1,16], index: 4, kind: input, shape index: {}]   ;;  %s474_s3 = inlined_call_operand.vmem [shape: f32[128,16], index: 3, kind: input, shape index: {}]   ;;  %s475_s5 = inlined_call_operand.vmem [shape: f32[8,16], index: 5, kind: output, shape index: {}]  }
   0x1   :  { %v36_v0 = vld [vmem:[%s470_s1 + $0x78] sm:$0xff]  ;;  %v35_v1 = vld [vmem:[%s470_s1 + $0x70] sm:$0xff]  ;;  %v34_v2 = vld [vmem:[%s470_s1 + $0x68] sm:$0xff] }
   0x2   :  { %41 = vmatpush.msra.mxu0 %v36_v0  ;;  %v33_v3 = vld [vmem:[%s470_s1 + $0x60] sm:$0xff]  ;;  %v32_v4 = vld [vmem:[%s470_s1 + $0x58] sm:$0xff]  ;;  %v31_v5 = vld [vmem:[%s470_s1 + $0x50] sm:$0xff] }
   0x3   :  { %v30_v6 = vld [vmem:[%s470_s1 + $0x48] sm:$0xff]  ;;  %v29_v7 = vld [vmem:[%s470_s1 + $0x40] sm:$0xff]  ;;  %v28_v8 = vld [vmem:[%s470_s1 + $0x38] sm:$0xff] }
   0x4   :  { %42 = vmatpush.msra.mxu0 %v35_v1  ;;  %v27_v9 = vld [vmem:[%s470_s1 + $0x30] sm:$0xff]  ;;  %v26_v10 = vld [vmem:[%s470_s1 + $0x28] sm:$0xff]  ;;  %v25_v11 = vld [vmem:[%s470_s1 + $0x20] sm:$0xff] }
   0x5   :  { %v24_v12 = vld [vmem:[%s470_s1 + $0x18] sm:$0xff]  ;;  %v23_v13 = vld [vmem:[%s470_s1 + $0x10] sm:$0xff]  ;;  %v22_v14 = vld [vmem:[%s470_s1 + $0x8] sm:$0xff] }
   0x6   :  { %43 = vmatpush.msra.mxu0 %v34_v2  ;;  %v21_v15 = vld [vmem:[%s470_s1] sm:$0xff]  ;;  %v255_v17 = vld [vmem:[%s470_s1 + $0xf8] sm:$0xff]  ;;  %v254_v18 = vld [vmem:[%s470_s1 + $0xf0] sm:$0xff] }
   0x7   :  { %v346_v16 = vld [vmem:[%s472_s0] sm:$0xff]  ;;  %128 = vmatpush.msra.mxu1 %v255_v17  ;;  %v253_v19 = vld [vmem:[%s470_s1 + $0xe8] sm:$0xff]  ;;  %v251_v22 = vld [vmem:[%s470_s1 + $0xd8] sm:$0xff] }
   0x8   :  { %44 = vmatpush.msra.mxu0 %v33_v3  ;;  %v258_v20 = vld [vmem:[%s471_s2] ss:$0 sm:$0xff]  ;;  %v250_v24 = vld [vmem:[%s470_s1 + $0xd0] sm:$0xff]  ;;  %v249_v26 = vld [vmem:[%s470_s1 + $0xc8] sm:$0xff] }
   0x9   :  { %129 = vmatpush.msra.mxu1 %v254_v18  ;;  %v252_v21 = vld [vmem:[%s470_s1 + $0xe0] sm:$0xff]  ;;  %v247_v30 = vld [vmem:[%s470_s1 + $0xb8] sm:$0xff]  ;;  %v246_v32 = vld [vmem:[%s470_s1 + $0xb0] sm:$0xff] }
   0xa   :  { %45 = vmatpush.msra.mxu0 %v32_v4  ;;  %v248_v28 = vld [vmem:[%s470_s1 + $0xc0] sm:$0xff]  ;;  %v245_v35 = vld [vmem:[%s470_s1 + $0xa8] sm:$0xff]  ;;  %v243_v41 = vld [vmem:[%s470_s1 + $0x98] sm:$0xff] }
   0xb   :  { %130 = vmatpush.msra.mxu1 %v253_v19  ;;  %v244_v38 = vld [vmem:[%s470_s1 + $0xa0] sm:$0xff]  ;;  %v242_v44 = vld [vmem:[%s470_s1 + $0x90] sm:$0xff]  ;;  %v241_v46 = vld [vmem:[%s470_s1 + $0x88] sm:$0xff] }
   0xc   :  { %46 = vmatpush.msra.mxu0 %v31_v5  ;;  %v240_v49 = vld [vmem:[%s470_s1 + $0x80] sm:$0xff]  ;;  %v204_v17 = vld [vmem:[%s474_s3 + $0x58] sm:$0xff] }
   0xd   :  { %131 = vmatpush.msra.mxu1 %v252_v21 }
   0xe   :  { %47 = vmatpush.msra.mxu0 %v30_v6 }
   0xf   :  { %132 = vmatpush.msra.mxu1 %v251_v22  ;;  %v202_v22 = vld [vmem:[%s474_s3 + $0x48] sm:$0xff] }
  0x10   :  { %48 = vmatpush.msra.mxu0 %v29_v7 }
  0x11   :  { %133 = vmatpush.msra.mxu1 %v250_v24  ;;  %v201_v24 = vld [vmem:[%s474_s3 + $0x40] sm:$0xff] }
  0x12   :  { %49 = vmatpush.msra.mxu0 %v28_v8 }
  0x13   :  { %134 = vmatpush.msra.mxu1 %v249_v26  ;;  %v200_v26 = vld [vmem:[%s474_s3 + $0x38] sm:$0xff] }
  0x14   :  { %50 = vmatpush.msra.mxu0 %v27_v9 }
  0x15   :  { %135 = vmatpush.msra.mxu1 %v248_v28  ;;  %v199_v28 = vld [vmem:[%s474_s3 + $0x30] sm:$0xff] }
  0x16   :  { %51 = vmatpush.msra.mxu0 %v26_v10 }
  0x17   :  { %136 = vmatpush.msra.mxu1 %v247_v30 }
  0x18   :  { %52 = vmatpush.msra.mxu0 %v25_v11 }
  0x19   :  { %137 = vmatpush.msra.mxu1 %v246_v32 }
  0x1a   :  { %53 = vmatpush.msra.mxu0 %v24_v12  ;;  %v208_v12 = vld [vmem:[%s474_s3 + $0x78] sm:$0xff] }
  0x1b   :  { %138 = vmatpush.msra.mxu1 %v245_v35  ;;  %213 = vmatpush.msra.mxu2 %v208_v12 }
  0x1c   :  { %54 = vmatpush.msra.mxu0 %v23_v13  ;;  %v207_v13 = vld [vmem:[%s474_s3 + $0x70] sm:$0xff] }
  0x1d   :  { %139 = vmatpush.msra.mxu1 %v244_v38  ;;  %214 = vmatpush.msra.mxu2 %v207_v13 }
  0x1e   :  { %55 = vmatpush.msra.mxu0 %v22_v14  ;;  %v259_v14 = vld [vmem:[%s471_s2 + $0x1] ss:$0 sm:$0xff] }
  0x1f   :  { %140 = vmatpush.msra.mxu1 %v243_v41  ;;  %v194_v41 = vld [vmem:[%s474_s3 + $0x8] sm:$0xff] }
  0x20   :  { %56 = vmatpush.msra.mxu0 %v21_v15  ;;  %v206_v15 = vld [vmem:[%s474_s3 + $0x68] sm:$0xff] }
  0x21   :  { %57 = vmatmul.f32.vlgmr.msra.gmra.mxu0 %v346_v16  ;;  %141 = vmatpush.msra.mxu1 %v242_v44  ;;  %v193_v44 = vld [vmem:[%s474_s3] sm:$0xff] }
  0x22   :  { %215 = vmatpush.msra.mxu2 %v206_v15 }
  0x23   :  { %142 = vmatpush.msra.mxu1 %v241_v46 }
  0x25   :  { %143 = vmatpush.msra.mxu1 %v240_v49 }
  0x9e   :  { %v58_v23 = vpop.f32.mrf.mxu0 }
  0x9f   :  { %v370_v25 = vadd.f32 %v258_v20, %v58_v23  ;;  %v203_v20 = vld [vmem:[%s474_s3 + $0x50] sm:$0xff] }
  0xa1   :  { %v62_v27 = vmul.f32 0.70710677, %v370_v25  ;;  %v61_v8 = vmul.f32 0.5, %v370_v25 }
  0xa3   :  { %v63_v29 = vmul.f32 %v62_v27, %v62_v27 }
  0xa5   :  { %v64_v31 = vmin.f32 %v63_v29, 16.0 }
  0xa7   :  { %v65_v33 = vmul.f32 2.1237322e-06, %v64_v31  ;;  %v76_v34 = vmul.f32 3.8918573e-05, %v64_v31 }
  0xa9   :  { %v66_v36 = vadd.f32 0.00028619796, %v65_v33  ;;  %v77_v37 = vadd.f32 0.001143296, %v76_v34  ;;  %v197_v34 = vld [vmem:[%s474_s3 + $0x20] sm:$0xff] }
  0xab   :  { %v67_v39 = vmul.f32 %v66_v36, %v64_v31  ;;  %v78_v40 = vmul.f32 %v77_v37, %v64_v31  ;;  %v196_v36 = vld [vmem:[%s474_s3 + $0x18] sm:$0xff] }
  0xad   :  { %v79_v42 = vadd.f32 0.014752088, %v78_v40  ;;  %v68_v43 = vadd.f32 0.0036580483, %v67_v39  ;;  %v195_v39 = vld [vmem:[%s474_s3 + $0x10] sm:$0xff] }
  0xaf   :  { %v80_v45 = vmul.f32 %v79_v42, %v64_v31  ;;  %v69_v48 = vmul.f32 %v68_v43, %v64_v31 }
  0xb1   :  { %v81_v47 = vadd.f32 0.112945676, %v80_v45  ;;  %v70_v52 = vadd.f32 0.05243302, %v69_v48 }
  0xb3   :  { %v82_v50 = vmul.f32 %v81_v47, %v64_v31  ;;  %v71_v55 = vmul.f32 %v70_v52, %v64_v31 }
  0xb5   :  { %v83_v51 = vadd.f32 0.4994258, %v82_v50  ;;  %v72_v56 = vadd.f32 0.18741608, %v71_v55 }
  0xb7   :  { %v84_v53 = vmul.f32 %v83_v51, %v64_v31  ;;  %v73_v58 = vmul.f32 %v72_v56, %v64_v31  ;;  %v198_v31 = vld [vmem:[%s474_s3 + $0x28] sm:$0xff] }
  0xb9   :  { %v85_v54 = vadd.f32 1.0, %v84_v53  ;;  %v74_v62 = vadd.f32 1.1283791, %v73_v58 }
  0xbb   :  { %261 = vrcp.f32 %v85_v54  ;;  %v97_v61 = vand.u32 2147483648, %v85_v54  ;;  %v95_v0 = vand.u32 2147483647, %v85_v54  ;;  %vm91_vm1 = vweird.f32 %v85_v54 }
  0xbc   :  { %v75_v3 = vmul.f32 %v74_v62, %v62_v27 }
  0xbd   :  { %v98_v2 = vor.u32 1.1754944e-38, %v97_v61  ;;  %vm96_vm3 = vcmp.eq.f32.partialorder %v95_v0, 8.507059e+37 }
  0xc1   :  { %v262_v57 = vpop.eup %261 }
  0xc2   :  { %v87_v59 = vmul.f32 %v262_v57, %v85_v54  ;;  %vm92_vm0 = vweird.f32 %v262_v57 }
  0xc3   :  { %vm93_vm2 = vmor %vm91_vm1, %vm92_vm0 }
  0xc4   :  { %v88_v60 = vsub.f32 1.0, %v87_v59 }
  0xc6   :  { %v89_v63 = vmul.f32 %v262_v57, %v88_v60 }
  0xc8   :  { %v90_v1 = vadd.f32 %v262_v57, %v89_v63 }
  0xca   :  { %v94_v4 = vsel %vm93_vm2, %v262_v57, %v90_v1 }
  0xcb   :  { %v99_v5 = vsel %vm96_vm3, %v98_v2, %v94_v4 }
  0xcc   :  { %v100_v6 = vmul.f32 %v99_v5, %v75_v3 }
  0xce   :  { %v239_v7 = vclamps-f32 %v100_v6, 1.0 }
  0xd0   :  { %v103_v9 = vadd.f32 1.0, %v239_v7  ;;  %v260_v7 = vld [vmem:[%s473_s4] ss:$0 sm:$0xff] }
  0xd2   :  { %v104_v10 = vmul.f32 %v103_v9, %v61_v8 }
  0xd4   :  { %v405_v11 = vadd.f32 %v104_v10, %v346_v16  ;;  %v205_v16 = vld [vmem:[%s474_s3 + $0x60] sm:$0xff] }
  0xd5   :  { %216 = vmatpush.msra.mxu2 %v205_v16 }
  0xd6   :  { %144 = vmatmul.f32.vlgmr.msra.gmra.mxu1 %v405_v11 }
  0xd7   :  { %217 = vmatpush.msra.mxu2 %v204_v17 }
  0xd9   :  { %218 = vmatpush.msra.mxu2 %v203_v20 }
  0xdb   :  { %219 = vmatpush.msra.mxu2 %v202_v22 }
  0xdd   :  { %220 = vmatpush.msra.mxu2 %v201_v24 }
  0xdf   :  { %221 = vmatpush.msra.mxu2 %v200_v26 }
  0xe1   :  { %222 = vmatpush.msra.mxu2 %v199_v28 }
  0xe3   :  { %223 = vmatpush.msra.mxu2 %v198_v31 }
  0xe5   :  { %224 = vmatpush.msra.mxu2 %v197_v34 }
  0xe7   :  { %225 = vmatpush.msra.mxu2 %v196_v36 }
  0xe9   :  { %226 = vmatpush.msra.mxu2 %v195_v39 }
  0xeb   :  { %227 = vmatpush.msra.mxu2 %v194_v41 }
  0xed   :  { %228 = vmatpush.msra.mxu2 %v193_v44 }
 0x153   :  { %v145_v18 = vpop.f32.mrf.mxu1 }
 0x154   :  { %v426_v19 = vadd.f32 %v259_v14, %v145_v18 }
 0x156   :  { %v149_v21 = vmul.f32 0.70710677, %v426_v19  ;;  %v148_v3 = vmul.f32 0.5, %v426_v19 }
 0x158   :  { %v150_v23 = vmul.f32 %v149_v21, %v149_v21 }
 0x15a   :  { %v151_v25 = vmin.f32 %v150_v23, 16.0 }
 0x15c   :  { %v152_v27 = vmul.f32 2.1237322e-06, %v151_v25  ;;  %v163_v29 = vmul.f32 3.8918573e-05, %v151_v25 }
 0x15e   :  { %v153_v30 = vadd.f32 0.00028619796, %v152_v27  ;;  %v164_v32 = vadd.f32 0.001143296, %v163_v29 }
 0x160   :  { %v154_v33 = vmul.f32 %v153_v30, %v151_v25  ;;  %v165_v35 = vmul.f32 %v164_v32, %v151_v25 }
 0x162   :  { %v166_v37 = vadd.f32 0.014752088, %v165_v35  ;;  %v155_v38 = vadd.f32 0.0036580483, %v154_v33 }
 0x164   :  { %v167_v40 = vmul.f32 %v166_v37, %v151_v25  ;;  %v156_v43 = vmul.f32 %v155_v38, %v151_v25 }
 0x166   :  { %v168_v42 = vadd.f32 0.112945676, %v167_v40  ;;  %v157_v47 = vadd.f32 0.05243302, %v156_v43 }
 0x168   :  { %v169_v45 = vmul.f32 %v168_v42, %v151_v25  ;;  %v158_v50 = vmul.f32 %v157_v47, %v151_v25 }
 0x16a   :  { %v170_v46 = vadd.f32 0.4994258, %v169_v45  ;;  %v159_v51 = vadd.f32 0.18741608, %v158_v50 }
 0x16c   :  { %v171_v48 = vmul.f32 %v170_v46, %v151_v25  ;;  %v160_v53 = vmul.f32 %v159_v51, %v151_v25 }
 0x16e   :  { %v172_v49 = vadd.f32 1.0, %v171_v48  ;;  %v161_v57 = vadd.f32 1.1283791, %v160_v53 }
 0x170   :  { %263 = vrcp.f32 %v172_v49  ;;  %v184_v56 = vand.u32 2147483648, %v172_v49  ;;  %v182_v59 = vand.u32 2147483647, %v172_v49  ;;  %vm178_vm5 = vweird.f32 %v172_v49 }
 0x171   :  { %v162_v62 = vmul.f32 %v161_v57, %v149_v21 }
 0x172   :  { %v185_v61 = vor.u32 1.1754944e-38, %v184_v56  ;;  %vm183_vm7 = vcmp.eq.f32.partialorder %v182_v59, 8.507059e+37 }
 0x176   :  { %v264_v52 = vpop.eup %263 }
 0x177   :  { %v174_v54 = vmul.f32 %v264_v52, %v172_v49  ;;  %vm179_vm4 = vweird.f32 %v264_v52 }
 0x178   :  { %vm180_vm6 = vmor %vm178_vm5, %vm179_vm4 }
 0x179   :  { %v175_v55 = vsub.f32 1.0, %v174_v54 }
 0x17b   :  { %v176_v58 = vmul.f32 %v264_v52, %v175_v55 }
 0x17d   :  { %v177_v60 = vadd.f32 %v264_v52, %v176_v58 }
 0x17f   :  { %v181_v63 = vsel %vm180_vm6, %v264_v52, %v177_v60 }
 0x180   :  { %v186_v0 = vsel %vm183_vm7, %v185_v61, %v181_v63 }
 0x181   :  { %v187_v1 = vmul.f32 %v186_v0, %v162_v62 }
 0x183   :  { %v257_v2 = vclamps-f32 %v187_v1, 1.0 }
 0x185   :  { %v190_v4 = vadd.f32 1.0, %v257_v2 }
 0x187   :  { %v191_v5 = vmul.f32 %v190_v4, %v148_v3 }
 0x189   :  { %v192_v6 = vadd.f32 %v191_v5, %v405_v11 }
 0x18b   :  { %229 = vmatmul.f32.vlgmr.msra.gmra.mxu2 %v192_v6 }
 0x20e   :  { %v230_v8 = vpop.f32.mrf.mxu2 }
 0x20f   :  { %v231_v9 = vadd.f32 %v260_v7, %v230_v8 }
 0x211   :  { %234 = vst.msk [vmem:[%s475_s5] sm:$0xff] %vm233_vm8, %v231_v9 }

</bundles_post_ra>
